<compile_context>
chip_gen: v7x
topology: tpu7x:2x2x1
jax: 0.10.0
libtpu: 0.0.40
codegen_flags: <defaults>
</compile_context>

<pallas_src>
import functools

import jax
import jax.numpy as jnp
from jax.experimental import pallas as pl
from jax.experimental.pallas import tpu as pltpu


def _make_ohem_kernel(ignore_label, hw, tile, grid_hw):
    ragged = (grid_hw * tile) != hw  # last pixel tile runs past H*W -> mask it

    def kernel(neg_log_thr_ref, logits_ref, tgt_ref, out_ref):
        # out_ref: (2, tile) f32 per-batch accumulator, resident across the hw axis
        #   row 0: sum of CE over kept pixels (per lane partial)
        #   row 1: kept-pixel count (per lane partial)
        i = pl.program_id(1)

        @pl.when(i == 0)
        def _():
            out_ref[...] = jnp.zeros_like(out_ref)

        logits = logits_ref[...].astype(jnp.float32)             # (C, tile)
        tgt = tgt_ref[...]                                       # (1, tile) int32

        # numerically stable logsumexp over the class (sublane) axis
        m = jnp.max(logits, axis=0, keepdims=True)               # (1, tile)
        ex = jnp.exp(logits - m)                                  # (C, tile)
        lse = m + jnp.log(jnp.sum(ex, axis=0, keepdims=True))     # (1, tile)

        # one-hot gather of the true-class logit (ignore_label never matches)
        onehot = jax.lax.broadcasted_iota(jnp.int32, logits.shape, 0) == tgt
        logit_true = jnp.sum(jnp.where(onehot, logits, 0.0), axis=0, keepdims=True)
        ce = lse - logit_true                                     # -log_softmax[label]

        valid = tgt != ignore_label
        if ragged:
            # mask lanes past H*W (their VMEM contents are unspecified; per-lane
            # math means they never contaminate valid lanes)
            pos = jax.lax.broadcasted_iota(jnp.int32, tgt.shape, 1) + i * tile
            valid = jnp.logical_and(valid, pos < hw)

        # OHEM keep test: prob_true <= thr  <=>  ce >= -log(thr).
        # Clamp ce at 0 so thr == 1.0 (neg_log_thr == 0) keeps every valid pixel
        # even if ce rounds to a tiny negative value.
        kept = jnp.logical_and(valid, jnp.maximum(ce, 0.0) >= neg_log_thr_ref[0])

        out_ref[0:1, :] += jnp.where(kept, ce, 0.0)
        out_ref[1:2, :] += kept.astype(jnp.float32)

    return kernel


def _pick_tile(hw, c, itemsize, tile_hw):
    """Lane tile (multiple of 128) sized so the logits block is ~2 MiB."""
    if tile_hw is None:
        padded_c = -(-c // 8) * 8                       # sublane padding of the class axis
        tile = (2 * 1024 * 1024) // max(padded_c * itemsize, 1)
        tile = max(1024, min((tile // 128) * 128, 16384))
    else:
        tile = max(128, (tile_hw // 128) * 128)
    if hw <= tile:
        return hw, 1                                    # single full-row block (any size allowed)
    return tile, pl.cdiv(hw, tile)                      # ragged tail masked in-kernel


def _find_threshold(predict, target, ignore_label, thresh, min_kept, factor):
    """Glue: OHEM threshold search on the tiny downsampled grid (plain JAX)."""
    # TODO(synk): scipy.ndimage.zoom (order=1 bilinear for prob, order=0 for target)
    # has no clean Pallas/JAX equivalent; approximated with strided nearest subsampling.
    n, c, h, w = predict.shape
    p_small = jax.nn.softmax(predict[:, :, ::factor, ::factor].astype(jnp.float32), axis=1)
    t_small = target[:, ::factor, ::factor].reshape(-1).astype(jnp.int32)

    mk = min_kept // (factor * factor)
    valid = t_small != ignore_label
    num_valid = jnp.sum(valid)

    cp = jnp.transpose(p_small, (1, 0, 2, 3)).reshape(c, -1)
    idx = jnp.arange(t_small.shape[0])
    pred = cp[jnp.clip(t_small, 0, c - 1), idx]
    pred = jnp.where(valid, pred, jnp.inf)                     # invalid -> sort to the end
    sorted_pred = jnp.sort(pred)
    k_th = jnp.clip(jnp.minimum(num_valid, mk) - 1, 0, t_small.shape[0] - 1)
    new_threshold = sorted_pred[k_th]

    thr = jnp.float32(thresh)
    threshold = jnp.where(
        mk >= num_valid,
        jnp.float32(1.0),
        jnp.where(jnp.logical_and(mk > 0, new_threshold > thr), new_threshold, thr),
    )
    return threshold.astype(jnp.float32)


@functools.partial(
    jax.jit,
    static_argnames=("ignore_label", "thresh", "min_kept", "factor", "tile_hw"),
)
def ohem_cross_entropy_2d(predict, target, ignore_label=255, thresh=0.7,
                          min_kept=100000, factor=8, tile_hw=None):
    """predict: (N, C, H, W) float logits; target: (N, H, W) int labels."""
    n, c, h, w = predict.shape
    hw = h * w

    threshold = _find_threshold(predict, target, ignore_label, thresh, min_kept, factor)
    neg_log_thr = (-jnp.log(threshold)).reshape(1).astype(jnp.float32)

    # Free reshapes only: no transpose, no pad, no dtype upcast before the kernel.
    logits = predict.reshape(n, c, hw)
    tgt = target.reshape(n, 1, hw).astype(jnp.int32)

    tile, grid_hw = _pick_tile(hw, c, predict.dtype.itemsize, tile_hw)

    partials = pl.pallas_call(
        _make_ohem_kernel(ignore_label, hw, tile, grid_hw),
        out_shape=jax.ShapeDtypeStruct((n, 2, tile), jnp.float32),
        grid_spec=pltpu.PrefetchScalarGridSpec(
            num_scalar_prefetch=1,                 # -log(threshold) -> SMEM
            grid=(n, grid_hw),
            in_specs=[
                pl.BlockSpec((None, c, tile), lambda b, i, nlt: (b, 0, i)),
                pl.BlockSpec((None, 1, tile), lambda b, i, nlt: (b, 0, i)),
            ],
            out_specs=pl.BlockSpec((None, 2, tile), lambda b, i, nlt: (b, 0, 0)),
        ),
        compiler_params=pltpu.CompilerParams(
            dimension_semantics=("parallel", "arbitrary"),
            vmem_limit_bytes=32 * 1024 * 1024,     # safe on v5e/v6e/v7x; room for big tiles
        ),
    )(neg_log_thr, logits, tgt)

    ce_sum = jnp.sum(partials[:, 0, :])
    kept_cnt = jnp.sum(partials[:, 1, :])
    # CrossEntropyLoss(ignore_index=...), mean over kept pixels; guard the
    # nothing-kept case (would otherwise be 0/0 -> NaN).
    return ce_sum / jnp.maximum(kept_cnt, 1.0)


def ohem_cross_entropy_2d_ref(predict, target, ignore_label=255, thresh=0.7,
                              min_kept=100000, factor=8):
    """Pure-JAX reference of the same forward pass (for correctness check)."""
    n, c, h, w = predict.shape
    threshold = _find_threshold(predict, target, ignore_label, thresh, min_kept, factor)
    prob = jax.nn.softmax(predict.astype(jnp.float32), axis=1)
    labels = target.reshape(-1).astype(jnp.int32)
    idx = jnp.arange(labels.shape[0])
    cl = jnp.clip(labels, 0, c - 1)
    pred = jnp.transpose(prob, (1, 0, 2, 3)).reshape(c, -1)[cl, idx]
    valid = labels != ignore_label
    kept = jnp.logical_and(valid, pred <= threshold)
    logp = jax.nn.log_softmax(predict.astype(jnp.float32), axis=1)
    lt = jnp.transpose(logp, (1, 0, 2, 3)).reshape(c, -1)[cl, idx]
    return -jnp.sum(jnp.where(kept, lt, 0.0)) / jnp.maximum(jnp.sum(kept), 1)


if __name__ == "__main__":
    key = jax.random.PRNGKey(0)
    k1, k2, k3, k4, k5, k6 = jax.random.split(key, 6)

    # small min_kept/factor so the OHEM threshold search path is actually exercised
    kwargs = dict(ignore_label=255, thresh=0.7, min_kept=50, factor=2)

    # --- case 1: single-block path (hw fits in one lane tile) -----------------
    n, c, h, w = 2, 4, 16, 16
    predict = jax.random.normal(k1, (n, c, h, w), dtype=jnp.float32)
    target = jax.random.randint(k2, (n, h, w), 0, c).astype(jnp.int32)
    ign_mask = jax.random.uniform(k3, (n, h, w)) < 0.1        # sprinkle ignore_label
    target = jnp.where(ign_mask, 255, target)

    loss = jax.block_until_ready(ohem_cross_entropy_2d(predict, target, **kwargs))
    ref = ohem_cross_entropy_2d_ref(predict, target, **kwargs)
    assert jnp.allclose(loss, ref, atol=1e-5, rtol=1e-5), (float(loss), float(ref))

    # --- case 2: multi-tile + ragged-tail path (tile_hw forced small) ---------
    n2, c2, h2, w2 = 1, 5, 12, 12           # hw = 144 -> 2 tiles of 128, masked tail
    predict2 = jax.random.normal(k4, (n2, c2, h2, w2), dtype=jnp.float32)
    target2 = jax.random.randint(k5, (n2, h2, w2), 0, c2).astype(jnp.int32)
    target2 = jnp.where(jax.random.uniform(k6, (n2, h2, w2)) < 0.1, 255, target2)

    loss2 = jax.block_until_ready(
        ohem_cross_entropy_2d(predict2, target2, tile_hw=128, **kwargs))
    ref2 = ohem_cross_entropy_2d_ref(predict2, target2, **kwargs)
    assert jnp.allclose(loss2, ref2, atol=1e-5, rtol=1e-5), (float(loss2), float(ref2))

    print("KERNEL_OK")
</pallas_src>

<mosaic_0001>
module attributes {stable_mosaic.version = 11 : i64} {
  func.func @kernel(%arg0: i32, %arg1: i32, %arg2: memref<1xf32, #tpu.memory_space<smem>>, %arg3: memref<1x4x256xf32, #tpu.memory_space<vmem>>, %arg4: memref<1x1x256xi32, #tpu.memory_space<vmem>>, %arg5: memref<1x2x256xf32, #tpu.memory_space<vmem>>) attributes {dimension_semantics = [#tpu.dimension_semantics<parallel>, #tpu.dimension_semantics<arbitrary>], iteration_bounds = array<i64: 2, 1>, scalar_prefetch = 1 : i64, scratch_operands = 0 : i64, tpu.core_type = #tpu.core_type<tc>, window_params = [{transform_indices = @transform_0, window_bounds = array<i64: 1, 4, 256>}, {transform_indices = @transform_1, window_bounds = array<i64: 1, 1, 256>}, {transform_indices = @transform_2, window_bounds = array<i64: 1, 2, 256>}]} {
    %c0_i32 = arith.constant 0 : i32
    %0 = arith.cmpi eq, %arg1, %c0_i32 : i32
    %1 = arith.extui %0 : i1 to i32
    %c0_i32_0 = arith.constant 0 : i32
    %2 = arith.cmpi ne, %1, %c0_i32_0 : i32
    scf.if %2 {
      %cst_23 = arith.constant 0.000000e+00 : f32
      %48 = vector.broadcast %cst_23 : f32 to vector<2x256xf32>
      %c0_24 = arith.constant 0 : index
      %c0_25 = arith.constant 0 : index
      %c0_26 = arith.constant 0 : index
      %49 = vector.load %arg5[%c0_24, %c0_25, %c0_26] : memref<1x2x256xf32, #tpu.memory_space<vmem>>, vector<1x2x256xf32>
      %50 = vector.shape_cast %49 : vector<1x2x256xf32> to vector<2x256xf32>
      %51 = vector.shape_cast %48 : vector<2x256xf32> to vector<1x2x256xf32>
      tpu.vector_store %arg5[%c0_24, %c0_25, %c0_26], %51 {strides = array<i32>} : memref<1x2x256xf32, #tpu.memory_space<vmem>>, vector<1x2x256xf32>,
    } else {
    }
    %c0 = arith.constant 0 : index
    %c0_1 = arith.constant 0 : index
    %c0_2 = arith.constant 0 : index
    %3 = vector.load %arg3[%c0, %c0_1, %c0_2] : memref<1x4x256xf32, #tpu.memory_space<vmem>>, vector<1x4x256xf32>
    %4 = vector.shape_cast %3 : vector<1x4x256xf32> to vector<4x256xf32>
    %c0_3 = arith.constant 0 : index
    %c0_4 = arith.constant 0 : index
    %c0_5 = arith.constant 0 : index
    %5 = vector.load %arg4[%c0_3, %c0_4, %c0_5] : memref<1x1x256xi32, #tpu.memory_space<vmem>>, vector<1x1x256xi32>
    %6 = vector.shape_cast %5 : vector<1x1x256xi32> to vector<1x256xi32>
    %cst = arith.constant dense<0xFF800000> : vector<256xf32>
    %7 = vector.multi_reduction <maximumf>, %4, %cst [0] : vector<4x256xf32> to vector<256xf32>
    %8 = vector.shape_cast %7 : vector<256xf32> to vector<1x256xf32>
    %9 = vector.broadcast %8 : vector<1x256xf32> to vector<4x256xf32>
    %10 = arith.subf %4, %9 : vector<4x256xf32>
    %11 = math.exp %10 : vector<4x256xf32>
    %cst_6 = arith.constant dense<0.000000e+00> : vector<256xf32>
    %12 = vector.multi_reduction <add>, %11, %cst_6 [0] : vector<4x256xf32> to vector<256xf32>
    %13 = vector.shape_cast %12 : vector<256xf32> to vector<1x256xf32>
    %14 = math.log %13 : vector<1x256xf32>
    %15 = arith.addf %8, %14 : vector<1x256xf32>
    %16 = tpu.iota {dimensions = array<i32: 0>} : vector<4x256xi32>
    %17 = vector.broadcast %6 : vector<1x256xi32> to vector<4x256xi32>
    %18 = arith.cmpi eq, %16, %17 : vector<4x256xi32>
    %cst_7 = arith.constant 0.000000e+00 : f32
    %19 = vector.broadcast %cst_7 : f32 to vector<4x256xf32>
    %20 = arith.select %18, %4, %19 : vector<4x256xi1>, vector<4x256xf32>
    %cst_8 = arith.constant dense<0.000000e+00> : vector<256xf32>
    %21 = vector.multi_reduction <add>, %20, %cst_8 [0] : vector<4x256xf32> to vector<256xf32>
    %22 = vector.shape_cast %21 : vector<256xf32> to vector<1x256xf32>
    %23 = arith.subf %15, %22 : vector<1x256xf32>
    %c255_i32 = arith.constant 255 : i32
    %24 = vector.broadcast %c255_i32 : i32 to vector<1x256xi32>
    %25 = arith.cmpi ne, %6, %24 : vector<1x256xi32>
    %cst_9 = arith.constant 0.000000e+00 : f32
    %26 = vector.broadcast %cst_9 : f32 to vector<1x256xf32>
    %27 = arith.maximumf %23, %26 : vector<1x256xf32>
    %c0_10 = arith.constant 0 : index
    %28 = memref.load %arg2[%c0_10] : memref<1xf32, #tpu.memory_space<smem>>
    %29 = vector.broadcast %28 : f32 to vector<1x256xf32>
    %30 = arith.cmpf oge, %27, %29 : vector<1x256xf32>
    %31 = arith.andi %25, %30 : vector<1x256xi1>
    %c0_11 = arith.constant 0 : index
    %c0_12 = arith.constant 0 : index
    %c0_13 = arith.constant 0 : index
    %32 = vector.load %arg5[%c0_11, %c0_12, %c0_13] : memref<1x2x256xf32, #tpu.memory_space<vmem>>, vector<1x1x256xf32>
    %33 = vector.shape_cast %32 : vector<1x1x256xf32> to vector<1x256xf32>
    %cst_14 = arith.constant 0.000000e+00 : f32
    %34 = vector.broadcast %cst_14 : f32 to vector<1x256xf32>
    %35 = arith.select %31, %23, %34 : vector<1x256xi1>, vector<1x256xf32>
    %36 = arith.addf %33, %35 : vector<1x256xf32>
    %c0_15 = arith.constant 0 : index
    %c0_16 = arith.constant 0 : index
    %c0_17 = arith.constant 0 : index
    %37 = vector.load %arg5[%c0_15, %c0_16, %c0_17] : memref<1x2x256xf32, #tpu.memory_space<vmem>>, vector<1x1x256xf32>
    %38 = vector.shape_cast %37 : vector<1x1x256xf32> to vector<1x256xf32>
    %39 = vector.shape_cast %36 : vector<1x256xf32> to vector<1x1x256xf32>
    tpu.vector_store %arg5[%c0_15, %c0_16, %c0_17], %39 {strides = array<i32>} : memref<1x2x256xf32, #tpu.memory_space<vmem>>, vector<1x1x256xf32>,
    %c0_18 = arith.constant 0 : index
    %c1 = arith.constant 1 : index
    %c0_19 = arith.constant 0 : index
    %40 = vector.load %arg5[%c0_18, %c1, %c0_19] : memref<1x2x256xf32, #tpu.memory_space<vmem>>, vector<1x1x256xf32>
    %41 = vector.shape_cast %40 : vector<1x1x256xf32> to vector<1x256xf32>
    %42 = arith.extui %31 : vector<1x256xi1> to vector<1x256xi32>
    %43 = arith.sitofp %42 : vector<1x256xi32> to vector<1x256xf32>
    %44 = arith.addf %41, %43 : vector<1x256xf32>
    %c0_20 = arith.constant 0 : index
    %c1_21 = arith.constant 1 : index
    %c0_22 = arith.constant 0 : index
    %45 = vector.load %arg5[%c0_20, %c1_21, %c0_22] : memref<1x2x256xf32, #tpu.memory_space<vmem>>, vector<1x1x256xf32>
    %46 = vector.shape_cast %45 : vector<1x1x256xf32> to vector<1x256xf32>
    %47 = vector.shape_cast %44 : vector<1x256xf32> to vector<1x1x256xf32>
    tpu.vector_store %arg5[%c0_20, %c1_21, %c0_22], %47 {strides = array<i32>} : memref<1x2x256xf32, #tpu.memory_space<vmem>>, vector<1x1x256xf32>,
    return
  }
  func.func @transform_0(%arg0: i32, %arg1: i32, %arg2: memref<1xf32, #tpu.memory_space<smem>>) -> (i32, i32, i32) {
    %c0_i32 = arith.constant 0 : i32
    %c0_i32_0 = arith.constant 0 : i32
    return %arg0, %c0_i32, %arg1 : i32, i32, i32
  }
  func.func @transform_1(%arg0: i32, %arg1: i32, %arg2: memref<1xf32, #tpu.memory_space<smem>>) -> (i32, i32, i32) {
    %c0_i32 = arith.constant 0 : i32
    %c0_i32_0 = arith.constant 0 : i32
    return %arg0, %c0_i32, %arg1 : i32, i32, i32
  }
  func.func @transform_2(%arg0: i32, %arg1: i32, %arg2: memref<1xf32, #tpu.memory_space<smem>>) -> (i32, i32, i32) {
    %c0_i32 = arith.constant 0 : i32
    %c0_i32_0 = arith.constant 0 : i32
    %c0_i32_1 = arith.constant 0 : i32
    return %arg0, %c0_i32, %c0_i32_0 : i32, i32, i32
  }
}

</mosaic_0001>

<bundles_post_ra>
// kernel: ohem_cross_entropy_2d.1
= control target key start
LH: loop header
LB: loop body
LE: loop exit
PB: predicated region body
PF: predicated region fallthrough
CT: control target
= control target key end

     0   :  { %s535_s14 = smov 0   ;;  %s537_s15 = smov 0   ;;  %s605_s0 = inlined_call_operand.<no memory space> [shape: f32[1], index: 0, kind: input, shape index: {}]   ;;  %s606_s1 = inlined_call_operand.vmem [shape: f32[2,4,256], index: 1, kind: input, shape index: {}]   ;;  %s607_s2 = inlined_call_operand.vmem [shape: s32[2,1,256], index: 2, kind: input, shape index: {}]   ;;  %s608_s3 = inlined_call_operand.vmem [shape: f32[2,2,256], index: 3, kind: output, shape index: {}]  }
   0x1   :  { %8 = sst [smem:[#allocation3]] %s605_s0  ;;  %s539_s16 = smov 0  }
   0x2 LB: > { %s26_s0 = sadd.s32 1, %s503_s15  ;;  %p438_p0 = scmp.ge.s32.totalorder %s507_s16, 1  ;;  %s507_s16 = sphi %s539_s16, %s14_s16   ;;  %s503_s15 = sphi %s537_s15, %s610_s15   ;;  %s499_s14 = sphi %s535_s14, %s609_s14  }
   0x3   : > { %p28_p1 = scmp.ge.s32.totalorder %s26_s0, 2  ;;  %p149_p2 = scmp.lt.s32.totalorder %s507_s16, 3 }
   0x5   : > { %s612_s0 = smov (%p28_p1, %s26_s0), 0  ;;  %p150_p3 = pnand %p438_p0, %p149_p2 }
   0x6   : > { %p184_p4 = scmp.lt.s32.totalorder (!%p150_p3), %s499_s14, 1  ;;  %vm217_vm0 = vcmask (!%p150_p3), 1043456   ;;  %v509_v3 = vmov (!%p150_p3), 0.0   ;;  %v262_v16 = vlaneseq (!%p150_p3)  ;;  %s295_s29 = sld [smem:[#allocation3]] (!%p150_p3) }
   0x7   : > { %153 = sbr.rel (%p150_p3) target bundleno = 98 (0x62), region = 28 }
   0x8   : > { %v571_v19 = vshrl.u32 (!%p150_p3), %v262_v16, 7  ;;  %vm341_vm8 = vcmp.lt.s32.totalorder (!%p150_p3), %v262_v16, 256 }
   0xa   : > { %v266_v22 = vsub.s32 (!%p150_p3), 0, %v571_v19  ;;  %v270_v24 = vsub.s32 (!%p150_p3), 1, %v571_v19 }
   0xe   : > { %s614_s14 = smov (!%p184_p4, %s499_s14), 1 }
   0xf   : > { %s449_s17 = sshll.u32 %s614_s14, 3  ;;  %s450_s21 = sshll.u32 %s614_s14, 2 }
  0x10   : > { %s191_s20 = scalar_lea.vmem %s606_s1, %s449_s17  ;;  %s563_s24 = scalar_lea.vmem %s608_s3, %s450_s21 }
  0x11   : > { %v212_v0 = vld [vmem:[%s191_s20] sm:$0xff]  ;;  %211 = vst [vmem:[%s563_s24] sm:$0xf] %v509_v3  ;;  %s441_s25 = sshll.u32 %s614_s14, 1 }
  0x12   : > { %v215_v1 = vcombine.high %v212_v0, %v212_v0  ;;  %v218_v2 = vsel %vm217_vm0, %v212_v0, -inf  ;;  %s200_s28 = scalar_lea.vmem %s607_s2, %s441_s25 }
  0x13   : > { %v219_v4 = vrot.slane %v218_v2, 4  ;;  %v577_v23 = vld [vmem:[%s200_s28] sm:$0x3] }
  0x14   : > { %v225_v5 = vsel %vm217_vm0, %v215_v1, -inf  ;;  %v267_v25 = vrot.slane %v577_v23, %v266_v22  ;;  %v271_v26 = vrot.slane %v577_v23, %v270_v24  ;;  %vm292_vm5 = vcmp.ne.s32.totalorder %v577_v23, 255 }
  0x15   : > { %v220_v6 = vmax.f32 %v218_v2, %v219_v4  ;;  %v226_v7 = vrot.slane %v225_v5, 4 }
  0x16   : > { %vm272_vm1 = vcmp.eq.s32.totalorder %v571_v19, %v267_v25  ;;  %vm273_vm2 = vcmp.eq.s32.totalorder %v571_v19, %v271_v26 }
  0x17   : > { %v221_v8 = vrot.slane %v220_v6, 2  ;;  %v227_v9 = vmax.f32 %v225_v5, %v226_v7  ;;  %v274_v27 = vsel %vm272_vm1, %v212_v0, 0.0  ;;  %v275_v31 = vsel %vm273_vm2, %v215_v1, 0.0 }
  0x18   : > { %v276_v33 = vsel %vm217_vm0, %v274_v27, 0.0  ;;  %v283_v37 = vsel %vm217_vm0, %v275_v31, 0.0  ;;  %v296_v5 = vstv %s295_s29  ;;  %v318_v22 = vld [vmem:[%s563_s24] ss:$2 sm:$0x3] }
  0x19   : > { %v222_v10 = vmax.f32 %v220_v6, %v221_v8  ;;  %v228_v11 = vrot.slane %v227_v9, 2  ;;  %v277_v38 = vrot.slane %v276_v33, 4  ;;  %v284_v41 = vrot.slane %v283_v37, 4  ;;  %v444_v24 = vld [vmem:[%s563_s24 + $0x1] ss:$2 sm:$0x3] }
  0x1b   : > { %v223_v12 = vrot.slane %v222_v10, 1  ;;  %v229_v13 = vmax.f32 %v227_v9, %v228_v11  ;;  %v278_v44 = vadd.f32 %v277_v38, %v276_v33  ;;  %v285_v47 = vadd.f32 %v284_v41, %v283_v37 }
  0x1c   : > { %v511_v11 = vmov 0  }
  0x1d   : > { %v224_v14 = vmax.f32 %v222_v10, %v223_v12  ;;  %v230_v15 = vrot.slane %v229_v13, 1  ;;  %v279_v50 = vrot.slane %v278_v44, 2  ;;  %v286_v52 = vrot.slane %v285_v47, 2 }
  0x1f   : > { %v231_v17 = vmax.f32 %v229_v13, %v230_v15  ;;  %v280_v53 = vadd.f32 %v279_v50, %v278_v44  ;;  %v287_v54 = vadd.f32 %v286_v52, %v285_v47 }
  0x21   : > { %v234_v18 = vcombine.low %v224_v14, %v231_v17  ;;  %v281_v55 = vrot.slane %v280_v53, 1  ;;  %v288_v56 = vrot.slane %v287_v54, 1 }
  0x23   : > { %v236_v20 = vsub.f32 %v212_v0, %v234_v18  ;;  %v282_v59 = vadd.f32 %v281_v55, %v280_v53  ;;  %v289_v63 = vadd.f32 %v288_v56, %v287_v54  ;;  %v510_v0 = vmov 1966171168  }
  0x24   : > { %v303_v1 = vunpack.c.l.s4 %v510_v0 }
  0x25   : > { %v237_v21 = vmul.f32 1.442695, %v236_v20 }
  0x26   : > { %v304_v8 = vunpack.c.0.s8 %v303_v1 }
  0x27   : > { %479 = vpow2.f32 %v237_v21 }
  0x28   : > { %v307_v13 = vsub.s32 %v304_v8, %v571_v19 }
  0x31   : > { %v480_v28 = vpop.eup %479 }
  0x32   : > { %v240_v29 = vcombine.high %v480_v28, %v480_v28  ;;  %v242_v30 = vsel %vm217_vm0, %v480_v28, 0.0 }
  0x33   : > { %v243_v32 = vrot.slane %v242_v30, 4 }
  0x34   : > { %v249_v34 = vsel %vm217_vm0, %v240_v29, 0.0 }
  0x35   : > { %v244_v35 = vadd.f32 %v243_v32, %v242_v30  ;;  %v250_v36 = vrot.slane %v249_v34, 4 }
  0x37   : > { %v245_v39 = vrot.slane %v244_v35, 2  ;;  %v251_v40 = vadd.f32 %v250_v36, %v249_v34 }
  0x39   : > { %v246_v42 = vadd.f32 %v245_v39, %v244_v35  ;;  %v252_v43 = vrot.slane %v251_v40, 2 }
  0x3b   : > { %v247_v45 = vrot.slane %v246_v42, 1  ;;  %v253_v46 = vadd.f32 %v252_v43, %v251_v40 }
  0x3d   : > { %v248_v48 = vadd.f32 %v247_v45, %v246_v42  ;;  %v254_v49 = vrot.slane %v253_v46, 1 }
  0x3f   : > { %v255_v51 = vadd.f32 %v254_v49, %v253_v46  ;;  %481 = vlog2.f32 %v248_v48 }
  0x41   : > { %483 = vlog2.f32 %v255_v51 }
  0x49   : > { %v482_v57 = vpop.eup %481 }
  0x4a   : > { %v257_v58 = vmul.f32 0.6931472, %v482_v57 }
  0x4b   : > { %v484_v60 = vpop.eup %483 }
  0x4c   : > { %v259_v61 = vmul.f32 0.6931472, %v484_v60  ;;  %v260_v62 = vadd.f32 %v257_v58, %v224_v14 }
  0x4e   : > { %v261_v2 = vadd.f32 %v259_v61, %v231_v17  ;;  %v290_v4 = vsub.f32 %v260_v62, %v282_v59 }
  0x50   : > { %v291_v6 = vsub.f32 %v261_v2, %v289_v63  ;;  %v293_v7 = vmax.f32 %v290_v4, 0.0 }
  0x52   : > { %v294_v9 = vmax.f32 %v291_v6, 0.0  ;;  %vm297_vm3 = vcmp.ge.f32.partialorder %v293_v7, %v296_v5  ;;  %v321_v10 = vcombine.low %v290_v4, %v291_v6 }
  0x53   : > { %v299_v12 = vsel %vm297_vm3, 1, %v511_v11 }
  0x54   : > { %vm298_vm4 = vcmp.ge.f32.partialorder %v294_v9, %v296_v5  ;;  %v328_v17 = vrot.slane %v321_v10, %v307_v13 }
  0x55   : > { %v300_v14 = vsel %vm298_vm4, 1, %v511_v11 }
  0x56   : > { %v301_v15 = vcombine.low %v299_v12, %v300_v14  ;;  %v335_v21 = vrot.slane %v328_v17, %v307_v13 }
  0x58   : > { %v308_v18 = vrot.slane %v301_v15, %v307_v13 }
  0x5a   : > { %v315_v20 = vrot.slane %v308_v18, %v307_v13 }
  0x5c   : > { %vm316_vm6 = vcmp.ne.s32.totalorder %v315_v20, 0 }
  0x5d   : > { %vm317_vm7 = vmand %vm292_vm5, %vm316_vm6 }
  0x5e   : > { %v337_v25 = vsel %vm317_vm7, %v335_v21, 0.0  ;;  %v445_v26 = vsel %vm317_vm7, 1.0, %v509_v3 }
  0x5f   : > { %v338_v19 = vadd.f32 %v337_v25, %v318_v22  ;;  %v348_v27 = vadd.f32 %v445_v26, %v444_v24 }
  0x61   : > { %343 = vst.msk [vmem:[%s563_s24] ss:$2 sm:$0x3] %vm341_vm8, %v338_v19  ;;  %446 = vst.msk [vmem:[%s563_s24 + $0x1] ss:$2 sm:$0x3] %vm341_vm8, %v348_v27 }
  0x62 PF: > { %s14_s16 = sadd.s32 1, %s507_s16   ;;  %s609_s14 = smov %s503_s15 }
  0x63   : > { %p11_p5 = scmp.ge.s32.totalorder %s14_s16, 4   ;;  %s610_s15 = smov %s612_s0 }
  0x65   :  { %13 = sbr.rel (!%p11_p5) target bundleno = 2 (0x2), region = 66 }

</bundles_post_ra>
